<compile_context>
chip_gen: v7x
topology: tpu7x:2x2x1
jax: 0.10.0
libtpu: 0.0.40
codegen_flags: <defaults>
</compile_context>

<pallas_src>
import numpy as np
import jax
import jax.numpy as jnp
from jax.experimental import pallas as pl
from jax.experimental.pallas import tpu as pltpu


def parametrized_net_kernel(xT_ref, zT_ref, wh_ref, oT_ref):
    """One batch tile of the ParametrizedNet forward, batch on the lane axis.

    xT : (E, Bt)   input, transposed
    zT : (L, Bt)   latent, transposed
    wh : (E*E, L)  HyperNet Linear weight, native PyTorch (out, in) layout
    oT : (E, Bt)   output, transposed
    """
    e, bt = oT_ref.shape
    # HyperNet (no bias): weights_T[m, b] = sum_k wh[m, k] * z[b, k]   -> (E*E, Bt)
    weights_t = jnp.dot(wh_ref[...], zT_ref[...],
                        preferred_element_type=jnp.float32)
    # weights.view(-1, E, E):  w3[j, i, b] = weights[b, j*E + i].
    # Lane dim untouched, sublane dim E*E splits into E x E (E == 8 matches the
    # f32 sublane tile) -> layout-free reshape.
    w3 = weights_t.reshape(e, e, bt)
    # torch.bmm(x, w.transpose(-2, -1)).squeeze():
    #   out[b, j] = sum_i x[b, i] * w3[j, i, b]
    # VPU broadcast multiply + XLU sublane reduce; no selector matmuls.
    prod = w3 * xT_ref[...][None, :, :]                               # (E, E, Bt)
    oT_ref[...] = jnp.sum(prod, axis=1).astype(oT_ref.dtype)


@jax.jit
def parametrized_net_forward(x, z, wh):
    """Forward of ParametrizedNet(equivariant_size=E, latent_size=L).

    x  : (B, 1, E) float32
    z  : (B, L)    float32
    wh : (E*E, L)  float32  -- HyperNet Linear weight, PyTorch (out, in) layout
    returns (B, E) float32  (== torch.bmm(x, w.transpose(-2, -1)).squeeze())
    """
    B, one, E = x.shape
    assert one == 1
    L = z.shape[-1]
    EE = E * E
    assert wh.shape == (EE, L)

    # Layout plumbing (one XLA transpose each): batch -> lane axis.
    # TODO(synk): could be folded into the kernel (load (Bt,E)/(Bt,L) blocks and
    # transpose on the XLU) to shave this extra HBM round-trip at very large B.
    xT = x.reshape(B, E).T                                           # (E, B)
    zT = z.T                                                         # (L, B)

    # Batch tile: a multiple of 128 (lane-dense, unmasked stores on all but the
    # ragged final block), large enough to amortize the ~0.35us per-grid-step
    # cost, and chosen so the grid has >= 2 steps whenever B >= 256 so the
    # "parallel" axis shards across the two v7x TensorCores (no-op on v5e/v6e).
    # No jnp.pad: Pallas clips the ragged last block's input/output DMAs, and
    # garbage lanes never mix into valid ones (no cross-lane ops in the kernel).
    BT_MAX = 2048        # (EE, bt) f32 intermediates stay well inside even the
    b_ceil = pl.cdiv(B, 128) * 128          # v5e 16 MiB default scoped VMEM.
    if b_ceil <= 128:
        bt = 128
    else:
        bt = min(BT_MAX, max(128, ((b_ceil // 2) // 128) * 128))
    grid = (pl.cdiv(B, bt),)
    b_work = grid[0] * bt

    cost = pl.CostEstimate(
        flops=2 * b_work * EE * (L + 1),     # hypernet matmul + mul/reduce
        transcendentals=0,
        bytes_accessed=4 * (b_work * (E + L + E) + EE * L),
    )

    out_t = pl.pallas_call(
        parametrized_net_kernel,
        out_shape=jax.ShapeDtypeStruct((E, B), jnp.float32),
        grid=grid,
        in_specs=[
            pl.BlockSpec((E, bt), lambda b: (0, b)),   # xT : tiled over batch
            pl.BlockSpec((L, bt), lambda b: (0, b)),   # zT : tiled over batch
            pl.BlockSpec((EE, L), lambda b: (0, 0)),   # wh : grid-invariant, VMEM-resident
        ],
        out_specs=pl.BlockSpec((E, bt), lambda b: (0, b)),
        compiler_params=pltpu.CompilerParams(
            dimension_semantics=("parallel",),
        ),
        cost_estimate=cost,
    )(xT, zT, wh)

    # TODO(synk): the PyTorch module also stashes `self.mat = w.detach().cpu()`
    # (host-side debug side effect); not represented here.
    return out_t.T                                                   # (B, E)


def _reference(x, z, wh):
    """Pure-JAX reference mirroring the PyTorch forward exactly (f32, HIGHEST)."""
    B, _, E = x.shape
    weights = jnp.dot(z, wh.T, precision=jax.lax.Precision.HIGHEST)  # (B, E*E)
    w3 = weights.reshape(B, E, E)                                    # .view(-1, E, E)
    return jnp.einsum("bi,bji->bj", x.reshape(B, E), w3,
                      precision=jax.lax.Precision.HIGHEST)           # bmm(x, w.T).squeeze()


if __name__ == "__main__":
    # Small shapes consistent with the module: equivariant_size E=8, latent_size L=32.
    E, L = 8, 32
    key = jax.random.PRNGKey(0)
    kx, kz, kw, kx2, kz2 = jax.random.split(key, 5)

    # Deterministic synthetic init of HyperNet Linear(L, E*E, bias=False) weight.
    wh = jax.random.normal(kw, (E * E, L), dtype=jnp.float32) * (1.0 / np.sqrt(L))

    # Tiny batch (single ragged block).
    x = jax.random.normal(kx, (4, 1, E), dtype=jnp.float32)
    z = jax.random.normal(kz, (4, L), dtype=jnp.float32)
    out = jax.block_until_ready(parametrized_net_forward(x, z, wh))
    assert out.shape == (4, E)
    assert jnp.allclose(out, _reference(x, z, wh), atol=1e-4, rtol=1e-4)

    # Multi-step grid with a ragged final block (exercises unpadded tiling).
    x2 = jax.random.normal(kx2, (300, 1, E), dtype=jnp.float32)
    z2 = jax.random.normal(kz2, (300, L), dtype=jnp.float32)
    out2 = jax.block_until_ready(parametrized_net_forward(x2, z2, wh))
    assert out2.shape == (300, E)
    assert jnp.allclose(out2, _reference(x2, z2, wh), atol=1e-4, rtol=1e-4)

    print("KERNEL_OK")
</pallas_src>

<mosaic_0001>
module attributes {stable_mosaic.version = 11 : i64} {
  func.func @parametrized_net_kernel(%arg0: i32, %arg1: memref<8x128xf32, #tpu.memory_space<vmem>>, %arg2: memref<32x128xf32, #tpu.memory_space<vmem>>, %arg3: memref<64x32xf32, #tpu.memory_space<vmem>>, %arg4: memref<8x128xf32, #tpu.memory_space<vmem>>) attributes {dimension_semantics = [#tpu.dimension_semantics<parallel>], iteration_bounds = array<i64: 1>, scalar_prefetch = 0 : i64, scratch_operands = 0 : i64, tpu.core_type = #tpu.core_type<tc>, window_params = [{transform_indices = @transform_0, window_bounds = array<i64: 8, 128>}, {transform_indices = @transform_1, window_bounds = array<i64: 32, 128>}, {pipeline_mode = #tpu.pipeline_mode<synchronous>, transform_indices = @transform_2, window_bounds = array<i64: 64, 32>}, {transform_indices = @transform_3, window_bounds = array<i64: 8, 128>}]} {
    %c0 = arith.constant 0 : index
    %c0_0 = arith.constant 0 : index
    %0 = vector.load %arg3[%c0, %c0_0] : memref<64x32xf32, #tpu.memory_space<vmem>>, vector<64x32xf32>
    %c0_1 = arith.constant 0 : index
    %c0_2 = arith.constant 0 : index
    %1 = vector.load %arg2[%c0_1, %c0_2] : memref<32x128xf32, #tpu.memory_space<vmem>>, vector<32x128xf32>
    %cst = arith.constant dense<0.000000e+00> : vector<64x128xf32>
    %2 = tpu.matmul %0, %1, %cst {dimension_numbers = #tpu.dot_dimension_numbers<[1], [0], [0], [1], [0, 0, 1, 1], [], []>} : vector<64x32xf32>, vector<32x128xf32>, vector<64x128xf32> -> vector<64x128xf32>
    %3 = vector.shape_cast %2 : vector<64x128xf32> to vector<8x8x128xf32>
    %c0_3 = arith.constant 0 : index
    %c0_4 = arith.constant 0 : index
    %4 = vector.load %arg1[%c0_3, %c0_4] : memref<8x128xf32, #tpu.memory_space<vmem>>, vector<8x128xf32>
    %5 = vector.shape_cast %4 : vector<8x128xf32> to vector<1x8x128xf32>
    %6 = vector.broadcast %5 : vector<1x8x128xf32> to vector<8x8x128xf32>
    %7 = arith.mulf %3, %6 : vector<8x8x128xf32>
    %cst_5 = arith.constant dense<0.000000e+00> : vector<8x128xf32>
    %8 = vector.multi_reduction <add>, %7, %cst_5 [1] : vector<8x8x128xf32> to vector<8x128xf32>
    %c0_6 = arith.constant 0 : index
    %c0_7 = arith.constant 0 : index
    %9 = vector.load %arg4[%c0_6, %c0_7] : memref<8x128xf32, #tpu.memory_space<vmem>>, vector<8x128xf32>
    tpu.vector_store %arg4[%c0_6, %c0_7], %8 {strides = array<i32>} : memref<8x128xf32, #tpu.memory_space<vmem>>, vector<8x128xf32>,
    return
  }
  func.func @transform_0(%arg0: i32) -> (i32, i32) {
    %c0_i32 = arith.constant 0 : i32
    %c0_i32_0 = arith.constant 0 : i32
    return %c0_i32, %arg0 : i32, i32
  }
  func.func @transform_1(%arg0: i32) -> (i32, i32) {
    %c0_i32 = arith.constant 0 : i32
    %c0_i32_0 = arith.constant 0 : i32
    return %c0_i32, %arg0 : i32, i32
  }
  func.func @transform_2(%arg0: i32) -> (i32, i32) {
    %c0_i32 = arith.constant 0 : i32
    %c0_i32_0 = arith.constant 0 : i32
    %c0_i32_1 = arith.constant 0 : i32
    return %c0_i32, %c0_i32_0 : i32, i32
  }
  func.func @transform_3(%arg0: i32) -> (i32, i32) {
    %c0_i32 = arith.constant 0 : i32
    %c0_i32_0 = arith.constant 0 : i32
    return %c0_i32, %arg0 : i32, i32
  }
}

</mosaic_0001>

<bundles_post_ra>
// kernel: parametrized_net_forward.1
= control target key start
LH: loop header
LB: loop body
LE: loop exit
PB: predicated region body
PF: predicated region fallthrough
CT: control target
= control target key end

     0   :  { %vm26_vm0 = vcmask 261120   ;;  %vm221_vm1 = vcmask 1041409   ;;  %vm223_vm2 = vcmask 1042434   ;;  %vm225_vm3 = vcmask 1043459   ;;  %s363_s1 = inlined_call_operand.vmem [shape: f32[32,4], index: 1, kind: input, shape index: {}]   ;;  %s364_s2 = inlined_call_operand.vmem [shape: f32[64,32], index: 2, kind: input, shape index: {}]   ;;  %s365_s0 = inlined_call_operand.vmem [shape: f32[8,4], index: 0, kind: input, shape index: {}]   ;;  %s366_s3 = inlined_call_operand.vmem [shape: f32[8,4], index: 3, kind: output, shape index: {}]  }
   0x1   :  { %v22_v0 = vld [vmem:[%s363_s1] sm:$0xff]  ;;  %v23_v1 = vld [vmem:[%s363_s1 + $0x8] sm:$0xff]  ;;  %v24_v2 = vld [vmem:[%s363_s1 + $0x10] sm:$0xff]  ;;  %vm227_vm4 = vcmask 1044484   ;;  %vm229_vm5 = vcmask 1045509   ;;  %vm231_vm6 = vcmask 1046534  }
   0x2   :  { %v281_v3 = vpack.c.bf16 %v23_v1, %v22_v0  ;;  %v25_v4 = vld [vmem:[%s363_s1 + $0x18] sm:$0xff]  ;;  %v14_v5 = vld [vmem:[%s364_s2] sm:$0xff]  ;;  %v15_v8 = vld [vmem:[%s364_s2 + $0x8] sm:$0xff]  ;;  %vm233_vm7 = vcmask 1047559  }
   0x3   :  { %v18_v6 = vld [vmem:[%s364_s2 + $0x20] sm:$0xff]  ;;  %v285_v7 = vpack.c.bf16 %v25_v4, %v24_v2  ;;  %269 = vmatprep.mubr.msk.f32.mxu0 %vm26_vm0, %v14_v5  ;;  %v19_v9 = vld [vmem:[%s364_s2 + $0x28] sm:$0xff]  ;;  %v16_v10 = vld [vmem:[%s364_s2 + $0x10] sm:$0xff] }
   0x4   :  { %275 = vmatprep.mubr.msk.f32.mxu1 %vm26_vm0, %v18_v6  ;;  %282 = vmatprep.subr.bf16.mxu0 %v281_v3  ;;  %v20_v11 = vld [vmem:[%s364_s2 + $0x30] sm:$0xff]  ;;  %v17_v12 = vld [vmem:[%s364_s2 + $0x18] sm:$0xff]  ;;  %v156_v14 = vld [vmem:[%s365_s0] sm:$0xff] }
   0x5   :  { %289 = vmatprep.subr.bf16.mxu1 %v281_v3  ;;  %284 = vmatpush3.bf16.msra.mxu0 %v281_v3  ;;  %v21_v13 = vld [vmem:[%s364_s2 + $0x38] sm:$0xff] }
   0x6   :  { %291 = vmatpush3.bf16.msra.mxu1 %v281_v3  ;;  %286 = vmatprep.subr.bf16.mxu0 %v285_v7 }
   0x7   :  { %290 = vmatprep.subr.bf16.mxu1 %v285_v7 }
   0x9   :  { %288 = vmatpush3.bf16.msra.mxu0 %v285_v7 }
   0xa   :  { %292 = vmatpush3.bf16.msra.mxu1 %v285_v7 }
   0xc   :  { %270 = vmatmul.mubr.msk.f32.vlgmr.msra.gmra.mrb[0].mxu0 %vm26_vm0, %v15_v8 }
   0xd   :  { %276 = vmatmul.mubr.msk.f32.vlgmr.msra.gmra.mrb[0].mxu1 %vm26_vm0, %v19_v9  ;;  %272 = vmatprep.mubr.msk.f32.mxu0 %vm26_vm0, %v16_v10 }
   0xe   :  { %278 = vmatprep.mubr.msk.f32.mxu1 %vm26_vm0, %v20_v11 }
  0x10   :  { %273 = vmatmul.mubr.msk.f32.gmra.mrb[2].mxu0 %vm26_vm0, %v17_v12 }
  0x11   :  { %279 = vmatmul.mubr.msk.f32.gmra.mrb[2].mxu1 %vm26_vm0, %v21_v13 }
  0xdf   :  { %v271_v15 = vpop.f32.mrb[0].mxu0 }
  0xe0   :  { %v277_v16 = vpop.f32.mrb[0].mxu1  ;;  %v158_v17 = vmul.f32 %v271_v15, %v156_v14  ;;  %v117_v19 = vpop.f32.mrb[1].mxu0 }
  0xe1   :  { %v162_v18 = vmul.f32 %v277_v16, %v156_v14  ;;  %v137_v20 = vpop.f32.mrb[1].mxu1  ;;  %v157_v21 = vmul.f32 %v156_v14, %v117_v19 }
  0xe2   :  { %v161_v22 = vmul.f32 %v156_v14, %v137_v20  ;;  %v171_v23 = vrot.slane %v158_v17, 4 }
  0xe3   :  { %v195_v24 = vrot.slane %v162_v18, 4  ;;  %v165_v25 = vrot.slane %v157_v21, 4  ;;  %v274_v27 = vpop.f32.mrb[2].mxu0 }
  0xe4   :  { %v189_v26 = vrot.slane %v161_v22, 4  ;;  %v280_v28 = vpop.f32.mrb[2].mxu1  ;;  %v172_v29 = vadd.f32 %v171_v23, %v158_v17  ;;  %v160_v31 = vmul.f32 %v274_v27, %v156_v14  ;;  %v127_v33 = vpop.f32.mrb[3].mxu0 }
  0xe5   :  { %v196_v30 = vadd.f32 %v195_v24, %v162_v18  ;;  %v164_v32 = vmul.f32 %v280_v28, %v156_v14  ;;  %v147_v34 = vpop.f32.mrb[3].mxu1  ;;  %v166_v35 = vadd.f32 %v165_v25, %v157_v21  ;;  %v159_v37 = vmul.f32 %v156_v14, %v127_v33 }
  0xe6   :  { %v190_v36 = vadd.f32 %v189_v26, %v161_v22  ;;  %v163_v38 = vmul.f32 %v156_v14, %v147_v34  ;;  %v173_v39 = vrot.slane %v172_v29, 2  ;;  %v183_v40 = vrot.slane %v160_v31, 4 }
  0xe7   :  { %v207_v41 = vrot.slane %v164_v32, 4  ;;  %v167_v42 = vrot.slane %v166_v35, 2  ;;  %v177_v44 = vrot.slane %v159_v37, 4  ;;  %v197_v47 = vrot.slane %v196_v30, 2 }
  0xe8   :  { %v191_v43 = vrot.slane %v190_v36, 2  ;;  %v201_v45 = vrot.slane %v163_v38, 4  ;;  %v174_v46 = vadd.f32 %v173_v39, %v172_v29  ;;  %v184_v48 = vadd.f32 %v183_v40, %v160_v31 }
  0xe9   :  { %v208_v49 = vadd.f32 %v207_v41, %v164_v32  ;;  %v168_v50 = vadd.f32 %v167_v42, %v166_v35  ;;  %v178_v51 = vadd.f32 %v177_v44, %v159_v37  ;;  %v198_v61 = vadd.f32 %v197_v47, %v196_v30 }
  0xea   :  { %v202_v52 = vadd.f32 %v201_v45, %v163_v38  ;;  %v175_v53 = vrot.slane %v174_v46, 1  ;;  %v185_v54 = vrot.slane %v184_v48, 2  ;;  %v192_v57 = vadd.f32 %v191_v43, %v190_v36 }
  0xeb   :  { %v209_v55 = vrot.slane %v208_v49, 2  ;;  %v169_v56 = vrot.slane %v168_v50, 1  ;;  %v179_v58 = vrot.slane %v178_v51, 2  ;;  %v199_v7 = vrot.slane %v198_v61, 1 }
  0xec   :  { %v203_v59 = vrot.slane %v202_v52, 2  ;;  %v176_v60 = vadd.f32 %v175_v53, %v174_v46  ;;  %v186_v62 = vadd.f32 %v185_v54, %v184_v48  ;;  %v193_v5 = vrot.slane %v192_v57, 1 }
  0xed   :  { %v170_v63 = vadd.f32 %v169_v56, %v168_v50  ;;  %v180_v0 = vadd.f32 %v179_v58, %v178_v51  ;;  %v210_v3 = vadd.f32 %v209_v55, %v208_v49  ;;  %v200_v14 = vadd.f32 %v199_v7, %v198_v61 }
  0xee   :  { %v204_v1 = vadd.f32 %v203_v59, %v202_v52  ;;  %v187_v2 = vrot.slane %v186_v62, 1  ;;  %v194_v12 = vadd.f32 %v193_v5, %v192_v57 }
  0xef   :  { %v222_v4 = vsel %vm221_vm1, %v176_v60, %v170_v63  ;;  %v181_v6 = vrot.slane %v180_v0, 1  ;;  %v211_v11 = vrot.slane %v210_v3, 1 }
  0xf0   :  { %v205_v9 = vrot.slane %v204_v1, 1  ;;  %v188_v10 = vadd.f32 %v187_v2, %v186_v62 }
  0xf1   :  { %v182_v8 = vadd.f32 %v181_v6, %v180_v0  ;;  %v212_v18 = vadd.f32 %v211_v11, %v210_v3 }
  0xf2   :  { %v206_v16 = vadd.f32 %v205_v9, %v204_v1 }
  0xf3   :  { %v224_v13 = vsel %vm223_vm2, %v182_v8, %v222_v4 }
  0xf4   :  { %v226_v15 = vsel %vm225_vm3, %v188_v10, %v224_v13 }
  0xf5   :  { %v228_v17 = vsel %vm227_vm4, %v194_v12, %v226_v15 }
  0xf6   :  { %v230_v19 = vsel %vm229_vm5, %v200_v14, %v228_v17 }
  0xf7   :  { %v232_v20 = vsel %vm231_vm6, %v206_v16, %v230_v19 }
  0xf8   :  { %v234_v21 = vsel %vm233_vm7, %v212_v18, %v232_v20 }
  0xf9   :  { %236 = vst [vmem:[%s366_s3] sm:$0xff] %v234_v21 }

</bundles_post_ra>
